<compile_context>
chip_gen: v7x
topology: tpu7x:2x2x1
jax: 0.10.0
libtpu: 0.0.40
codegen_flags: <defaults>
</compile_context>

<pallas_src>
import numpy as np
import jax
import jax.numpy as jnp
from jax.experimental import pallas as pl
from jax.experimental.pallas import tpu as pltpu


# ---------------------------------------------------------------------------
# Glue: linspace + seasonality basis matrices (tiny host-side constants)
# ---------------------------------------------------------------------------
def linspace(backcast_length, forecast_length):
    lin_space = np.linspace(-backcast_length, forecast_length,
                            backcast_length + forecast_length)
    b_ls = lin_space[:backcast_length]
    f_ls = lin_space[backcast_length:]
    return b_ls, f_ls


def seasonality_basis(p, t):
    """S matrix of shape (p, len(t)) matching seasonality_model's construction."""
    assert p < 10, "thetas_dim is too big."
    p1, p2 = (p // 2, p // 2) if p % 2 == 0 else (p // 2, p // 2 + 1)
    s1 = np.stack([np.cos(2 * np.pi * i * t) for i in range(p1)], axis=0)
    s2 = np.stack([np.sin(2 * np.pi * i * t) for i in range(p2)], axis=0)
    S = np.concatenate([s1, s2], axis=0).astype(np.float32)
    return jnp.asarray(S)


def _round_up(x, m):
    return ((x + m - 1) // m) * m


# ---------------------------------------------------------------------------
# Pallas kernel: one TM-row tile of the full SeasonalityBlock forward
# ---------------------------------------------------------------------------
def seasonality_block_kernel(x_ref,
                             w1_ref, b1_ref,
                             w2_ref, b2_ref,
                             w3_ref, b3_ref,
                             w4_ref, b4_ref,
                             wcat_ref, bcat_ref,
                             out_ref):
    f32 = jnp.float32
    x = x_ref[...]

    # fc1..fc4 with ReLU (dropout = identity in eval)
    h = jnp.maximum(jnp.dot(x, w1_ref[...], preferred_element_type=f32) + b1_ref[...], 0.0)
    h = jnp.maximum(jnp.dot(h, w2_ref[...], preferred_element_type=f32) + b2_ref[...], 0.0)
    h = jnp.maximum(jnp.dot(h, w3_ref[...], preferred_element_type=f32) + b3_ref[...], 0.0)
    h = jnp.maximum(jnp.dot(h, w4_ref[...], preferred_element_type=f32) + b4_ref[...], 0.0)

    # Fused theta projection + both seasonality bases: one lane-dense store.
    out_ref[...] = jnp.dot(h, wcat_ref[...], preferred_element_type=f32) + bcat_ref[...]


# ---------------------------------------------------------------------------
# Wrapper
# ---------------------------------------------------------------------------
def seasonality_block_forward(x, params, S_b, S_f, tile_rows=2048):
    """x: (B, C, backcast_length) float32. Returns (backcast, forecast)."""
    B, C, Lb = x.shape
    Lf = S_f.shape[1]
    Lout = Lb + Lf
    N = B * C
    units = params["w1"].shape[1]
    x2 = x.reshape(N, Lb).astype(jnp.float32)

    # Fold shared theta fc with both seasonality bases (share_thetas=True):
    #   theta @ S_b  and  theta @ S_f  ->  h @ (wt @ [S_b|S_f]) + bt @ [S_b|S_f]
    # Zero-pad the fused output dim up to a multiple of 128 lanes so the
    # output store is unmasked / lane-dense; padding columns compute to 0 and
    # are sliced away below.
    # NOTE: at very large horizons (Lout in the hundreds) with units >= 256 the
    # fold multiplies final-layer MXU FLOPs by ~units/thetas_dim; keep the
    # theta path in-kernel in that regime instead.
    Lpad = _round_up(Lout, 128)
    S_cat = jnp.concatenate([S_b, S_f], axis=1)                 # (thetas_dim, Lout)
    W_cat = jnp.dot(params["wt"], S_cat)                        # (units, Lout)
    b_cat = jnp.dot(params["bt"], S_cat)                        # (1, Lout)
    W_cat = jnp.pad(W_cat, ((0, 0), (0, Lpad - Lout)))          # (units, Lpad)
    b_cat = jnp.pad(b_cat, ((0, 0), (0, Lpad - Lout)))          # (1, Lpad)

    # --- Row tile selection ---------------------------------------------
    # Multiple of 8 sublanes regardless of caller input; big tiles amortize
    # the ~0.35 us per-grid-step overhead (per-step footprint is tiny: even at
    # TM=4096 the x tile is <2 MiB and the padded out tile ~2 MiB per buffer).
    TM = max(8, (int(tile_rows) // 8) * 8)
    N8 = _round_up(N, 8)
    TM = min(TM, N8)
    # v7x: make sure the grid has >= 2 steps when N allows it so
    # dimension_semantics=("parallel",) can shard rows across both TCs.
    if N8 > 8:
        half8 = max(8, _round_up(-(-N // 2), 8))
        TM = min(TM, half8)
    grid = (pl.cdiv(N, TM),)   # ragged trailing block handled by Pallas masking

    def const_spec(arr):
        # Resident weights: same block every grid step (no re-DMA), and
        # single-buffered — the second pipeline buffer would be wasted VMEM.
        return pl.BlockSpec(arr.shape, lambda i: (0, 0),
                            pipeline_mode=pl.Buffered(1))

    # Advisory cost model for the surrounding XLA schedule.
    flops = 2 * N * (Lb * units + 3 * units * units + units * Lpad)
    weight_bytes = 4 * (Lb * units + 3 * units * units + 4 * units
                        + units * Lpad + Lpad)
    cost = pl.CostEstimate(flops=flops, transcendentals=0,
                           bytes_accessed=4 * N * (Lb + Lpad) + weight_bytes)

    out = pl.pallas_call(
        seasonality_block_kernel,
        out_shape=jax.ShapeDtypeStruct((N, Lpad), jnp.float32),
        grid=grid,
        in_specs=[
            pl.BlockSpec((TM, Lb), lambda i: (i, 0)),           # streamed x tile
            const_spec(params["w1"]), const_spec(params["b1"]),
            const_spec(params["w2"]), const_spec(params["b2"]),
            const_spec(params["w3"]), const_spec(params["b3"]),
            const_spec(params["w4"]), const_spec(params["b4"]),
            const_spec(W_cat), const_spec(b_cat),
        ],
        out_specs=pl.BlockSpec((TM, Lpad), lambda i: (i, 0)),   # lane-dense slab
        compiler_params=pltpu.CompilerParams(
            dimension_semantics=("parallel",),                   # shard rows on v7x's 2 TCs
            vmem_limit_bytes=32 * 1024 * 1024,
        ),
        cost_estimate=cost,
    )(x2,
      params["w1"], params["b1"],
      params["w2"], params["b2"],
      params["w3"], params["b3"],
      params["w4"], params["b4"],
      W_cat, b_cat)

    back = out[:, :Lb].reshape(B, C, Lb)
    fore = out[:, Lb:Lout].reshape(B, C, Lf)
    return back, fore


# ---------------------------------------------------------------------------
# Deterministic parameter init + pure-JAX reference
# ---------------------------------------------------------------------------
def init_params(key, backcast_length, units, thetas_dim):
    ks = jax.random.split(key, 10)

    def lin(kw, kb, fan_in, fan_out):
        bound = 1.0 / np.sqrt(fan_in)
        w = jax.random.uniform(kw, (fan_in, fan_out), jnp.float32, -bound, bound)
        b = jax.random.uniform(kb, (1, fan_out), jnp.float32, -bound, bound)
        return w, b

    p = {}
    p["w1"], p["b1"] = lin(ks[0], ks[1], backcast_length, units)
    p["w2"], p["b2"] = lin(ks[2], ks[3], units, units)
    p["w3"], p["b3"] = lin(ks[4], ks[5], units, units)
    p["w4"], p["b4"] = lin(ks[6], ks[7], units, units)
    p["wt"], p["bt"] = lin(ks[8], ks[9], units, thetas_dim)  # shared theta fc
    return p


def reference_forward(x, params, S_b, S_f):
    B, C, Lb = x.shape
    h = x.reshape(B * C, Lb)
    h = jnp.maximum(h @ params["w1"] + params["b1"], 0.0)
    h = jnp.maximum(h @ params["w2"] + params["b2"], 0.0)
    h = jnp.maximum(h @ params["w3"] + params["b3"], 0.0)
    h = jnp.maximum(h @ params["w4"] + params["b4"], 0.0)
    theta = h @ params["wt"] + params["bt"]
    back = (theta @ S_b).reshape(B, C, -1)
    fore = (theta @ S_f).reshape(B, C, -1)
    return back, fore


if __name__ == "__main__":
    # Small shapes consistent with the module defaults.
    B, C = 2, 4                        # thetas.shape[0], thetas.shape[1]
    backcast_length, forecast_length = 10, 5
    units, thetas_dim = 32, 4          # thetas_dim < 10 as asserted in the module
    # TODO(synk): dropout layers are identity (eval mode / p=0.0); no RNG dropout in-kernel.

    key = jax.random.PRNGKey(0)
    kx, kp = jax.random.split(key)

    x = jax.random.normal(kx, (B, C, backcast_length), dtype=jnp.float32)
    params = init_params(kp, backcast_length, units, thetas_dim)

    b_ls, f_ls = linspace(backcast_length, forecast_length)
    S_b = seasonality_basis(thetas_dim, b_ls)   # (thetas_dim, backcast_length)
    S_f = seasonality_basis(thetas_dim, f_ls)   # (thetas_dim, forecast_length)

    backcast, forecast = seasonality_block_forward(x, params, S_b, S_f)
    jax.block_until_ready((backcast, forecast))

    ref_back, ref_fore = reference_forward(x, params, S_b, S_f)
    np.testing.assert_allclose(np.asarray(backcast), np.asarray(ref_back),
                               rtol=1e-5, atol=1e-5)
    np.testing.assert_allclose(np.asarray(forecast), np.asarray(ref_fore),
                               rtol=1e-5, atol=1e-5)

    assert backcast.shape == (B, C, backcast_length)
    assert forecast.shape == (B, C, forecast_length)
    print("KERNEL_OK")
</pallas_src>

<mosaic_0001>
module attributes {stable_mosaic.version = 11 : i64} {
  func.func @seasonality_block_kernel(%arg0: i32, %arg1: memref<8x10xf32, #tpu.memory_space<vmem>>, %arg2: memref<10x32xf32, #tpu.memory_space<vmem>>, %arg3: memref<1x32xf32, #tpu.memory_space<vmem>>, %arg4: memref<32x32xf32, #tpu.memory_space<vmem>>, %arg5: memref<1x32xf32, #tpu.memory_space<vmem>>, %arg6: memref<32x32xf32, #tpu.memory_space<vmem>>, %arg7: memref<1x32xf32, #tpu.memory_space<vmem>>, %arg8: memref<32x32xf32, #tpu.memory_space<vmem>>, %arg9: memref<1x32xf32, #tpu.memory_space<vmem>>, %arg10: memref<32x128xf32, #tpu.memory_space<vmem>>, %arg11: memref<1x128xf32, #tpu.memory_space<vmem>>, %arg12: memref<8x128xf32, #tpu.memory_space<vmem>>) attributes {dimension_semantics = [#tpu.dimension_semantics<parallel>], iteration_bounds = array<i64: 1>, scalar_prefetch = 0 : i64, scratch_operands = 0 : i64, tpu.core_type = #tpu.core_type<tc>, window_params = [{transform_indices = @transform_0, window_bounds = array<i64: 8, 10>}, {pipeline_mode = #tpu.pipeline_mode<synchronous>, transform_indices = @transform_1, window_bounds = array<i64: 10, 32>}, {pipeline_mode = #tpu.pipeline_mode<synchronous>, transform_indices = @transform_2, window_bounds = array<i64: 1, 32>}, {pipeline_mode = #tpu.pipeline_mode<synchronous>, transform_indices = @transform_3, window_bounds = array<i64: 32, 32>}, {pipeline_mode = #tpu.pipeline_mode<synchronous>, transform_indices = @transform_4, window_bounds = array<i64: 1, 32>}, {pipeline_mode = #tpu.pipeline_mode<synchronous>, transform_indices = @transform_5, window_bounds = array<i64: 32, 32>}, {pipeline_mode = #tpu.pipeline_mode<synchronous>, transform_indices = @transform_6, window_bounds = array<i64: 1, 32>}, {pipeline_mode = #tpu.pipeline_mode<synchronous>, transform_indices = @transform_7, window_bounds = array<i64: 32, 32>}, {pipeline_mode = #tpu.pipeline_mode<synchronous>, transform_indices = @transform_8, window_bounds = array<i64: 1, 32>}, {pipeline_mode = #tpu.pipeline_mode<synchronous>, transform_indices = @transform_9, window_bounds = array<i64: 32, 128>}, {pipeline_mode = #tpu.pipeline_mode<synchronous>, transform_indices = @transform_10, window_bounds = array<i64: 1, 128>}, {transform_indices = @transform_11, window_bounds = array<i64: 8, 128>}]} {
    %c0 = arith.constant 0 : index
    %c0_0 = arith.constant 0 : index
    %0 = vector.load %arg1[%c0, %c0_0] : memref<8x10xf32, #tpu.memory_space<vmem>>, vector<8x10xf32>
    %c0_1 = arith.constant 0 : index
    %c0_2 = arith.constant 0 : index
    %1 = vector.load %arg2[%c0_1, %c0_2] : memref<10x32xf32, #tpu.memory_space<vmem>>, vector<10x32xf32>
    %cst = arith.constant dense<0.000000e+00> : vector<8x32xf32>
    %2 = tpu.matmul %0, %1, %cst {dimension_numbers = #tpu.dot_dimension_numbers<[1], [0], [0], [1], [0, 0, 1, 1], [], []>} : vector<8x10xf32>, vector<10x32xf32>, vector<8x32xf32> -> vector<8x32xf32>
    %c0_3 = arith.constant 0 : index
    %c0_4 = arith.constant 0 : index
    %3 = vector.load %arg3[%c0_3, %c0_4] : memref<1x32xf32, #tpu.memory_space<vmem>>, vector<1x32xf32>
    %4 = vector.broadcast %3 : vector<1x32xf32> to vector<8x32xf32>
    %5 = arith.addf %2, %4 : vector<8x32xf32>
    %cst_5 = arith.constant 0.000000e+00 : f32
    %6 = vector.broadcast %cst_5 : f32 to vector<8x32xf32>
    %7 = arith.maximumf %5, %6 : vector<8x32xf32>
    %c0_6 = arith.constant 0 : index
    %c0_7 = arith.constant 0 : index
    %8 = vector.load %arg4[%c0_6, %c0_7] : memref<32x32xf32, #tpu.memory_space<vmem>>, vector<32x32xf32>
    %cst_8 = arith.constant dense<0.000000e+00> : vector<8x32xf32>
    %9 = tpu.matmul %7, %8, %cst_8 {dimension_numbers = #tpu.dot_dimension_numbers<[1], [0], [0], [1], [0, 0, 1, 1], [], []>} : vector<8x32xf32>, vector<32x32xf32>, vector<8x32xf32> -> vector<8x32xf32>
    %c0_9 = arith.constant 0 : index
    %c0_10 = arith.constant 0 : index
    %10 = vector.load %arg5[%c0_9, %c0_10] : memref<1x32xf32, #tpu.memory_space<vmem>>, vector<1x32xf32>
    %11 = vector.broadcast %10 : vector<1x32xf32> to vector<8x32xf32>
    %12 = arith.addf %9, %11 : vector<8x32xf32>
    %cst_11 = arith.constant 0.000000e+00 : f32
    %13 = vector.broadcast %cst_11 : f32 to vector<8x32xf32>
    %14 = arith.maximumf %12, %13 : vector<8x32xf32>
    %c0_12 = arith.constant 0 : index
    %c0_13 = arith.constant 0 : index
    %15 = vector.load %arg6[%c0_12, %c0_13] : memref<32x32xf32, #tpu.memory_space<vmem>>, vector<32x32xf32>
    %cst_14 = arith.constant dense<0.000000e+00> : vector<8x32xf32>
    %16 = tpu.matmul %14, %15, %cst_14 {dimension_numbers = #tpu.dot_dimension_numbers<[1], [0], [0], [1], [0, 0, 1, 1], [], []>} : vector<8x32xf32>, vector<32x32xf32>, vector<8x32xf32> -> vector<8x32xf32>
    %c0_15 = arith.constant 0 : index
    %c0_16 = arith.constant 0 : index
    %17 = vector.load %arg7[%c0_15, %c0_16] : memref<1x32xf32, #tpu.memory_space<vmem>>, vector<1x32xf32>
    %18 = vector.broadcast %17 : vector<1x32xf32> to vector<8x32xf32>
    %19 = arith.addf %16, %18 : vector<8x32xf32>
    %cst_17 = arith.constant 0.000000e+00 : f32
    %20 = vector.broadcast %cst_17 : f32 to vector<8x32xf32>
    %21 = arith.maximumf %19, %20 : vector<8x32xf32>
    %c0_18 = arith.constant 0 : index
    %c0_19 = arith.constant 0 : index
    %22 = vector.load %arg8[%c0_18, %c0_19] : memref<32x32xf32, #tpu.memory_space<vmem>>, vector<32x32xf32>
    %cst_20 = arith.constant dense<0.000000e+00> : vector<8x32xf32>
    %23 = tpu.matmul %21, %22, %cst_20 {dimension_numbers = #tpu.dot_dimension_numbers<[1], [0], [0], [1], [0, 0, 1, 1], [], []>} : vector<8x32xf32>, vector<32x32xf32>, vector<8x32xf32> -> vector<8x32xf32>
    %c0_21 = arith.constant 0 : index
    %c0_22 = arith.constant 0 : index
    %24 = vector.load %arg9[%c0_21, %c0_22] : memref<1x32xf32, #tpu.memory_space<vmem>>, vector<1x32xf32>
    %25 = vector.broadcast %24 : vector<1x32xf32> to vector<8x32xf32>
    %26 = arith.addf %23, %25 : vector<8x32xf32>
    %cst_23 = arith.constant 0.000000e+00 : f32
    %27 = vector.broadcast %cst_23 : f32 to vector<8x32xf32>
    %28 = arith.maximumf %26, %27 : vector<8x32xf32>
    %c0_24 = arith.constant 0 : index
    %c0_25 = arith.constant 0 : index
    %29 = vector.load %arg10[%c0_24, %c0_25] : memref<32x128xf32, #tpu.memory_space<vmem>>, vector<32x128xf32>
    %cst_26 = arith.constant dense<0.000000e+00> : vector<8x128xf32>
    %30 = tpu.matmul %28, %29, %cst_26 {dimension_numbers = #tpu.dot_dimension_numbers<[1], [0], [0], [1], [0, 0, 1, 1], [], []>} : vector<8x32xf32>, vector<32x128xf32>, vector<8x128xf32> -> vector<8x128xf32>
    %c0_27 = arith.constant 0 : index
    %c0_28 = arith.constant 0 : index
    %31 = vector.load %arg11[%c0_27, %c0_28] : memref<1x128xf32, #tpu.memory_space<vmem>>, vector<1x128xf32>
    %32 = vector.broadcast %31 : vector<1x128xf32> to vector<8x128xf32>
    %33 = arith.addf %30, %32 : vector<8x128xf32>
    %c0_29 = arith.constant 0 : index
    %c0_30 = arith.constant 0 : index
    %34 = vector.load %arg12[%c0_29, %c0_30] : memref<8x128xf32, #tpu.memory_space<vmem>>, vector<8x128xf32>
    tpu.vector_store %arg12[%c0_29, %c0_30], %33 {strides = array<i32>} : memref<8x128xf32, #tpu.memory_space<vmem>>, vector<8x128xf32>,
    return
  }
  func.func @transform_0(%arg0: i32) -> (i32, i32) {
    %c0_i32 = arith.constant 0 : i32
    %c0_i32_0 = arith.constant 0 : i32
    return %arg0, %c0_i32 : i32, i32
  }
  func.func @transform_1(%arg0: i32) -> (i32, i32) {
    %c0_i32 = arith.constant 0 : i32
    %c0_i32_0 = arith.constant 0 : i32
    %c0_i32_1 = arith.constant 0 : i32
    return %c0_i32, %c0_i32_0 : i32, i32
  }
  func.func @transform_2(%arg0: i32) -> (i32, i32) {
    %c0_i32 = arith.constant 0 : i32
    %c0_i32_0 = arith.constant 0 : i32
    %c0_i32_1 = arith.constant 0 : i32
    return %c0_i32, %c0_i32_0 : i32, i32
  }
  func.func @transform_3(%arg0: i32) -> (i32, i32) {
    %c0_i32 = arith.constant 0 : i32
    %c0_i32_0 = arith.constant 0 : i32
    %c0_i32_1 = arith.constant 0 : i32
    return %c0_i32, %c0_i32_0 : i32, i32
  }
  func.func @transform_4(%arg0: i32) -> (i32, i32) {
    %c0_i32 = arith.constant 0 : i32
    %c0_i32_0 = arith.constant 0 : i32
    %c0_i32_1 = arith.constant 0 : i32
    return %c0_i32, %c0_i32_0 : i32, i32
  }
  func.func @transform_5(%arg0: i32) -> (i32, i32) {
    %c0_i32 = arith.constant 0 : i32
    %c0_i32_0 = arith.constant 0 : i32
    %c0_i32_1 = arith.constant 0 : i32
    return %c0_i32, %c0_i32_0 : i32, i32
  }
  func.func @transform_6(%arg0: i32) -> (i32, i32) {
    %c0_i32 = arith.constant 0 : i32
    %c0_i32_0 = arith.constant 0 : i32
    %c0_i32_1 = arith.constant 0 : i32
    return %c0_i32, %c0_i32_0 : i32, i32
  }
  func.func @transform_7(%arg0: i32) -> (i32, i32) {
    %c0_i32 = arith.constant 0 : i32
    %c0_i32_0 = arith.constant 0 : i32
    %c0_i32_1 = arith.constant 0 : i32
    return %c0_i32, %c0_i32_0 : i32, i32
  }
  func.func @transform_8(%arg0: i32) -> (i32, i32) {
    %c0_i32 = arith.constant 0 : i32
    %c0_i32_0 = arith.constant 0 : i32
    %c0_i32_1 = arith.constant 0 : i32
    return %c0_i32, %c0_i32_0 : i32, i32
  }
  func.func @transform_9(%arg0: i32) -> (i32, i32) {
    %c0_i32 = arith.constant 0 : i32
    %c0_i32_0 = arith.constant 0 : i32
    %c0_i32_1 = arith.constant 0 : i32
    return %c0_i32, %c0_i32_0 : i32, i32
  }
  func.func @transform_10(%arg0: i32) -> (i32, i32) {
    %c0_i32 = arith.constant 0 : i32
    %c0_i32_0 = arith.constant 0 : i32
    %c0_i32_1 = arith.constant 0 : i32
    return %c0_i32, %c0_i32_0 : i32, i32
  }
  func.func @transform_11(%arg0: i32) -> (i32, i32) {
    %c0_i32 = arith.constant 0 : i32
    %c0_i32_0 = arith.constant 0 : i32
    return %arg0, %c0_i32 : i32, i32
  }
}

</mosaic_0001>

<bundles_post_ra>
// kernel: tpu_custom_call.1
= control target key start
LH: loop header
LB: loop body
LE: loop exit
PB: predicated region body
PF: predicated region fallthrough
CT: control target
= control target key end

     0   :  { %16 = vsyncpa [#allocation3], 0  ;;  %s1110_s0 = inlined_call_operand.hbm [shape: f32[8,10], index: 0, kind: input, shape index: {}]   ;;  %s1111_s1 = inlined_call_operand.hbm [shape: f32[10,32], index: 1, kind: input, shape index: {}]   ;;  %s1112_s2 = inlined_call_operand.vmem [shape: f32[1,32], index: 2, kind: input, shape index: {}]   ;;  %s1113_s3 = inlined_call_operand.hbm [shape: f32[32,32], index: 3, kind: input, shape index: {}]   ;;  %s1114_s4 = inlined_call_operand.vmem [shape: f32[1,32], index: 4, kind: input, shape index: {}]   ;;  %s1115_s5 = inlined_call_operand.hbm [shape: f32[32,32], index: 5, kind: input, shape index: {}]   ;;  %s1116_s6 = inlined_call_operand.hbm [shape: f32[1,32], index: 6, kind: input, shape index: {}]   ;;  %s1117_s7 = inlined_call_operand.hbm [shape: f32[32,32], index: 7, kind: input, shape index: {}]   ;;  %s1118_s8 = inlined_call_operand.hbm [shape: f32[1,32], index: 8, kind: input, shape index: {}]   ;;  %s1119_s9 = inlined_call_operand.vmem [shape: f32[32,128], index: 9, kind: input, shape index: {}]   ;;  %s1120_s10 = inlined_call_operand.vmem [shape: f32[1,128], index: 10, kind: input, shape index: {}]   ;;  %s1121_s11 = inlined_call_operand.hbm [shape: f32[8,128], index: 11, kind: output, shape index: {}]  }
   0x1   :  { %17 = vsyncpa [#allocation6], 0 }
   0x2   :  { %18 = vsyncpa [#allocation9], 0 }
   0x3   :  { %19 = vsyncpa [#allocation12], 0 }
   0x4   :  { %20 = vsyncpa [#allocation4], 0  ;;  %s889_s17 = smov [#allocation5]   ;;  %s703_s21 = scalar_lea.hbm %s1111_s1, 256 }
   0x5   :  { %s36_s18 = sshll.u32 %s889_s17, 4  ;;  %p704_p0 = scmp.ne.s32.totalorder %s1111_s1, %s703_s21  ;;  %s37_s18 = int_to_ptr.vmem [resolvable:$true] %s36_s18 }
   0x6   :  { %p707_p1 = scmp.lt.u32.totalorder %s703_s21, %s1111_s1 }
   0x8   :  { %p709_p2 = pnand %p707_p1, %p704_p0 }
   0xa   :  { %712 = shalt.err (!%p709_p2)
}
   0xb   :  { %s713_s26 = scalar_lea.vmem %s37_s18, 256  ;;  %p718_p4 = scmp.lt.s32.totalorder %s37_s18, %s37_s18 }
   0xc   :  { %p714_p3 = scmp.ne.s32.totalorder %s37_s18, %s713_s26  ;;  %p719_p5 = scmp.lt.s32.totalorder %s713_s26, %s713_s26 }
   0xe   :  { %p720_p6 = por %p719_p5, %p718_p4 }
  0x10   :  { %p721_p7 = pnand %p720_p6, %p714_p3 }
  0x12   :  { %724 = shalt.err (!%p721_p7)
}
  0x13   :  { %s890_s27 = smov 128   ;;  %s891_s28 = smov 8  }
  0x14   :  { %42 = dma.hbm_to_vmem [thread:$0]  %s1111_s1, 256, %s37_s18, [#allocation6], %s890_s27, %s890_s27, %s891_s28  }
  0x15   :  { %s892_s12 = smov [#allocation8]   ;;  %s893_s14 = smov [#allocation11]  }
  0x16   :  { %s64_s13 = sshll.u32 %s892_s12, 4  ;;  %s86_s15 = sshll.u32 %s893_s14, 4  ;;  %s65_s13 = int_to_ptr.vmem [resolvable:$true] %s64_s13  ;;  %s87_s15 = int_to_ptr.vmem [resolvable:$true] %s86_s15 }
  0x17   :  { %s725_s19 = scalar_lea.hbm %s1115_s5, 512 }
  0x18   :  { %p726_p8 = scmp.ne.s32.totalorder %s1115_s5, %s725_s19  ;;  %p729_p9 = scmp.lt.u32.totalorder %s725_s19, %s1115_s5 }
  0x1a   :  { %p731_p10 = pnand %p729_p9, %p726_p8 }
  0x1c   :  { %734 = shalt.err (!%p731_p10)
}
  0x1d   :  { %s735_s1 = scalar_lea.vmem %s65_s13, 512  ;;  %p740_p12 = scmp.lt.s32.totalorder %s65_s13, %s65_s13 }
  0x1e   :  { %p736_p11 = scmp.ne.s32.totalorder %s65_s13, %s735_s1  ;;  %p741_p13 = scmp.lt.s32.totalorder %s735_s1, %s735_s1 }
  0x20   :  { %p742_p0 = por %p741_p13, %p740_p12 }
  0x22   :  { %p743_p1 = pnand %p742_p0, %p736_p11 }
  0x24   :  { %746 = shalt.err (!%p743_p1)
}
  0x25   :  { %70 = dma.hbm_to_vmem [thread:$0]  %s1115_s5, 512, %s65_s13, [#allocation9], %s890_s27, %s890_s27, %s891_s28  }
  0x26   :  { %s747_s29 = scalar_lea.hbm %s1117_s7, 512 }
  0x27   :  { %p748_p2 = scmp.ne.s32.totalorder %s1117_s7, %s747_s29  ;;  %p751_p3 = scmp.lt.u32.totalorder %s747_s29, %s1117_s7 }
  0x29   :  { %p753_p4 = pnand %p751_p3, %p748_p2 }
  0x2b   :  { %756 = shalt.err (!%p753_p4)
}
  0x2c   :  { %s757_s17 = scalar_lea.vmem %s87_s15, 512  ;;  %p762_p6 = scmp.lt.s32.totalorder %s87_s15, %s87_s15 }
  0x2d   :  { %p758_p5 = scmp.ne.s32.totalorder %s87_s15, %s757_s17  ;;  %p763_p7 = scmp.lt.s32.totalorder %s757_s17, %s757_s17 }
  0x2f   :  { %p764_p8 = por %p763_p7, %p762_p6 }
  0x31   :  { %p765_p9 = pnand %p764_p8, %p758_p5 }
  0x33   :  { %768 = shalt.err (!%p765_p9)
}
  0x34   :  { %92 = dma.hbm_to_vmem [thread:$0]  %s1117_s7, 512, %s87_s15, [#allocation12], %s890_s27, %s890_s27, %s891_s28  }
  0x35   :  { %s894_s19 = smov [#allocation2]   ;;  %s895_s21 = smov [#allocation7]  }
  0x36   :  { %s27_s20 = sshll.u32 %s894_s19, 4  ;;  %s50_s22 = sshll.u32 %s895_s21, 4  ;;  %s28_s20 = int_to_ptr.vmem [resolvable:$true] %s27_s20  ;;  %s51_s22 = int_to_ptr.vmem [resolvable:$true] %s50_s22 }
  0x37   :  { %s769_s18 = scalar_lea.hbm %s1110_s0, 128 }
  0x38   :  { %p770_p10 = scmp.ne.s32.totalorder %s1110_s0, %s769_s18  ;;  %p773_p11 = scmp.lt.u32.totalorder %s769_s18, %s1110_s0 }
  0x3a   :  { %p775_p12 = pnand %p773_p11, %p770_p10 }
  0x3c   :  { %778 = shalt.err (!%p775_p12)
}
  0x3d   :  { %s779_s7 = scalar_lea.vmem %s28_s20, 128  ;;  %p784_p0 = scmp.lt.s32.totalorder %s28_s20, %s28_s20 }
  0x3e   :  { %p780_p13 = scmp.ne.s32.totalorder %s28_s20, %s779_s7  ;;  %p785_p1 = scmp.lt.s32.totalorder %s779_s7, %s779_s7 }
  0x40   :  { %p786_p2 = por %p785_p1, %p784_p0 }
  0x42   :  { %p787_p3 = pnand %p786_p2, %p780_p13 }
  0x44   :  { %790 = shalt.err (!%p787_p3)
}
  0x45   :  { %30 = dma.hbm_to_vmem [thread:$0]  %s1110_s0, 128, %s28_s20, [#allocation3]  }
  0x46   :  { %s791_s16 = scalar_lea.hbm %s1113_s3, 512 }
  0x47   :  { %p792_p4 = scmp.ne.s32.totalorder %s1113_s3, %s791_s16  ;;  %p795_p5 = scmp.lt.u32.totalorder %s791_s16, %s1113_s3 }
  0x49   :  { %p797_p6 = pnand %p795_p5, %p792_p4 }
  0x4b   :  { %800 = shalt.err (!%p797_p6)
}
  0x4c   :  { %s801_s21 = scalar_lea.vmem %s51_s22, 512  ;;  %p806_p8 = scmp.lt.s32.totalorder %s51_s22, %s51_s22 }
  0x4d   :  { %p802_p7 = scmp.ne.s32.totalorder %s51_s22, %s801_s21  ;;  %p807_p9 = scmp.lt.s32.totalorder %s801_s21, %s801_s21 }
  0x4f   :  { %p808_p10 = por %p807_p9, %p806_p8 }
  0x51   :  { %p809_p11 = pnand %p808_p10, %p802_p7 }
  0x53   :  { %812 = shalt.err (!%p809_p11)
}
  0x54   :  { %56 = dma.hbm_to_vmem [thread:$0]  %s1113_s3, 512, %s51_s22, [#allocation6], %s890_s27, %s890_s27, %s891_s28  }
  0x55   :  { %s896_s23 = smov [#allocation10]   ;;  %s897_s18 = smov [#allocation13]  }
  0x56   :  { %s77_s1 = sshll.u32 %s896_s23, 4  ;;  %s99_s24 = sshll.u32 %s897_s18, 4  ;;  %s78_s1 = int_to_ptr.vmem [resolvable:$true] %s77_s1  ;;  %s100_s24 = int_to_ptr.vmem [resolvable:$true] %s99_s24 }
  0x57   :  { %s813_s29 = scalar_lea.hbm %s1116_s6, 16 }
  0x58   :  { %p814_p12 = scmp.ne.s32.totalorder %s1116_s6, %s813_s29  ;;  %p817_p13 = scmp.lt.u32.totalorder %s813_s29, %s1116_s6 }
  0x5a   :  { %p819_p0 = pnand %p817_p13, %p814_p12 }
  0x5c   :  { %822 = shalt.err (!%p819_p0)
}
  0x5d   :  { %s823_s3 = scalar_lea.vmem %s78_s1, 16  ;;  %s827_s27 = scalar_lea.vmem %s78_s1, 32 }
  0x5e   :  { %p824_p1 = scmp.ne.s32.totalorder %s78_s1, %s823_s3  ;;  %p828_p2 = scmp.lt.s32.totalorder %s78_s1, %s78_s1 }
  0x5f   :  { %p829_p3 = scmp.lt.s32.totalorder %s827_s27, %s823_s3 }
  0x61   :  { %p830_p4 = por %p829_p3, %p828_p2 }
  0x63   :  { %p831_p5 = pnand %p830_p4, %p824_p1 }
  0x65   :  { %834 = shalt.err (!%p831_p5)
}
  0x66   :  { %80 = dma.hbm_to_vmem [thread:$0]  %s1116_s6, 16, %s78_s1, [#allocation9]  }
  0x67   :  { %s835_s17 = scalar_lea.hbm %s1118_s8, 16 }
  0x68   :  { %p836_p6 = scmp.ne.s32.totalorder %s1118_s8, %s835_s17  ;;  %p839_p7 = scmp.lt.u32.totalorder %s835_s17, %s1118_s8 }
  0x6a   :  { %p841_p8 = pnand %p839_p7, %p836_p6 }
  0x6c   :  { %844 = shalt.err (!%p841_p8)
}
  0x6d   :  { %s845_s0 = scalar_lea.vmem %s100_s24, 16  ;;  %s849_s20 = scalar_lea.vmem %s100_s24, 32 }
  0x6e   :  { %p846_p9 = scmp.ne.s32.totalorder %s100_s24, %s845_s0  ;;  %p850_p10 = scmp.lt.s32.totalorder %s100_s24, %s100_s24 }
  0x6f   :  { %p851_p11 = scmp.lt.s32.totalorder %s849_s20, %s845_s0 }
  0x71   :  { %p852_p12 = por %p851_p11, %p850_p10 }
  0x73   :  { %p853_p13 = pnand %p852_p12, %p846_p9 }
  0x75   :  { %856 = shalt.err (!%p853_p13)
}
  0x76   :  { %102 = dma.hbm_to_vmem [thread:$0]  %s1118_s8, 16, %s100_s24, [#allocation12]  }
  0x77   :  { %879 = dma.done.wait [#allocation3], 128  }
  0x78   :  { %880 = vsyncadd [#allocation3], 4294967168 }
  0x79   :  { %881 = dma.done.wait [#allocation6], 768  }
  0x7a   :  { %882 = vsyncadd [#allocation6], 4294966528 }
  0x7b   :  { %883 = dma.done.wait [#allocation9], 528  }
  0x7c   :  { %884 = vsyncadd [#allocation9], 4294966768 }
  0x7d   :  { %885 = dma.done.wait [#allocation12], 528  }
  0x7e   :  { %886 = vsyncadd [#allocation12], 4294966768  ;;  %v898_v0 = vmov 0.0|0.0   ;;  %vm899_vm0 = vmmov 0   ;;  %v900_v1 = vmov 0.0   ;;  %vm142_vm1 = vcmask 1041408  }
  0x7f   :  { %661 = vmatprep.subr.bf16.mxu0 %v898_v0  ;;  %665 = vmatprep.subr.bf16.mxu1 %v898_v0  ;;  %v129_v2 = vld [vmem:[#allocation5] sm:$0xff]  ;;  %v130_v3 = vld [vmem:[#allocation5 + $0x8] sm:$0x3]  ;;  %vm901_vm2 = vmmov 1   ;;  %v217_v5 = vld [vmem:[#allocation7] sm:$0xff]  ;;  %vm138_vm4 = vcmask 80896  }
  0x80   :  { %614 = vmatprep.mubr.msk.f32.mxu0 %vm899_vm0, %v900_v1  ;;  %625 = vmatprep.mubr.msk.f32.mxu1 %vm899_vm0, %v900_v1  ;;  %vm663_vm3 = vmpackc.low %vm142_vm1, %vm901_vm2  ;;  %v662_v4 = vpack.c.bf16 %v130_v3, %v129_v2  ;;  %v218_v6 = vld [vmem:[#allocation7 + $0x8] sm:$0xff]  ;;  %v219_v9 = vld [vmem:[#allocation7 + $0x10] sm:$0xff]  ;;  %vm228_vm5 = vcmask 261120   ;;  %s902_s27 = smov [#allocation14]  }
  0x81   :  { %v666_v7 = vpack.c.bf16 %v218_v6, %v217_v5  ;;  %v128_v8 = vld [vmem:[#allocation2] sm:$0xff]  ;;  %v220_v10 = vld [vmem:[#allocation7 + $0x18] sm:$0xff]  ;;  %v303_v12 = vld [vmem:[#allocation8] sm:$0xff]  ;;  %s564_s28 = sshll.u32 %s902_s27, 4  ;;  %s565_s28 = int_to_ptr.vmem [resolvable:$true] %s564_s28 }
  0x82   :  { %664 = vmatpush3.bf16.msk.msra.mxu0 %vm663_vm3, %v662_v4  ;;  %v669_v11 = vpack.c.bf16 %v220_v10, %v219_v9  ;;  %v304_v13 = vld [vmem:[#allocation8 + $0x8] sm:$0xff]  ;;  %v305_v20 = vld [vmem:[#allocation8 + $0x10] sm:$0xff]  ;;  %v306_v21 = vld [vmem:[#allocation8 + $0x18] sm:$0xff]  ;;  %p862_p1 = scmp.lt.s32.totalorder %s565_s28, %s565_s28 }
  0x83   :  { %667 = vmatpush3.bf16.msra.mxu1 %v666_v7  ;;  %671 = vmatprep.subr.bf16.mxu0 %v898_v0  ;;  %v672_v14 = vpack.c.bf16 %v304_v13, %v303_v12  ;;  %v576_v15 = vld [vmem:[%s1112_s2] ss:$0 sm:$0xff]  ;;  %v675_v22 = vpack.c.bf16 %v306_v21, %v305_v20  ;;  %v389_v24 = vld [vmem:[#allocation11 + $0x8] sm:$0xff]  ;;  %v390_v31 = vld [vmem:[#allocation11 + $0x10] sm:$0xff] }
  0x84   :  { %668 = vmatprep.subr.bf16.mxu1 %v898_v0  ;;  %v388_v23 = vld [vmem:[#allocation11] sm:$0xff]  ;;  %v391_v32 = vld [vmem:[#allocation11 + $0x18] sm:$0xff]  ;;  %v474_v35 = vld [vmem:[%s1119_s9 + $0x8] sm:$0xff] }
  0x85   :  { %615 = vmatmul.mubr.msk.f32.vlgmr.msra.gmra.mrb[0].mxu0 %vm138_vm4, %v128_v8  ;;  %v678_v25 = vpack.c.bf16 %v389_v24, %v388_v23  ;;  %v579_v26 = vld [vmem:[%s1114_s4] ss:$0 sm:$0xff]  ;;  %v681_v33 = vpack.c.bf16 %v391_v32, %v390_v31  ;;  %v581_v37 = vld [vmem:[#allocation10] ss:$0 sm:$0xff]  ;;  %v475_v42 = vld [vmem:[%s1119_s9 + $0x10] sm:$0xff] }
  0x86   :  { %636 = vmatprep.mubr.msk.f32.mxu0 %vm899_vm0, %v900_v1  ;;  %673 = vmatpush3.bf16.msra.mxu0 %v672_v14  ;;  %v473_v34 = vld [vmem:[%s1119_s9] sm:$0xff]  ;;  %v476_v43 = vld [vmem:[%s1119_s9 + $0x18] sm:$0xff]  ;;  %s857_s9 = scalar_lea.vmem %s565_s28, 128 }
  0x87   :  { %670 = vmatpush3.bf16.msra.mxu1 %v669_v11  ;;  %674 = vmatprep.subr.bf16.mxu0 %v898_v0  ;;  %v684_v36 = vpack.c.bf16 %v474_v35, %v473_v34  ;;  %v687_v44 = vpack.c.bf16 %v476_v43, %v475_v42  ;;  %v583_v45 = vld [vmem:[#allocation13] ss:$0 sm:$0xff]  ;;  %v585_v50 = vld [vmem:[%s1120_s10] ss:$0 sm:$0xff]  ;;  %p858_p0 = scmp.ne.s32.totalorder %s565_s28, %s857_s9  ;;  %p863_p2 = scmp.lt.s32.totalorder %s857_s9, %s857_s9 }
  0x88   :  { %677 = vmatprep.subr.bf16.mxu1 %v898_v0 }
  0x89   :  { %p864_p3 = por %p863_p2, %p862_p1 }
  0x8a   :  { %676 = vmatpush3.bf16.msra.mxu0 %v675_v22 }
  0x8b   :  { %683 = vmatprep.subr.bf16.mxu0 %v898_v0  ;;  %p865_p4 = pnand %p864_p3, %p858_p0 }
 0x158   :  { %v212_v16 = vpop.f32.mrb[0].mxu0 }
 0x159   :  { %v213_v17 = vadd.f32 %v576_v15, %v212_v16  ;;  %v616_v18 = vpop.f32.mrb[1].mxu0 }
 0x15b   :  { %v216_v19 = vmax.f32 %v213_v17, 0.0 }
 0x15d   :  { %626 = vmatmul.mubr.msk.f32.vlgmr.msra.gmra.mrb[0].mxu1 %vm228_vm5, %v216_v19 }
 0x15e   :  { %647 = vmatprep.mubr.msk.f32.mxu1 %vm899_vm0, %v900_v1  ;;  %679 = vmatpush3.bf16.msra.mxu1 %v678_v25 }
 0x15f   :  { %680 = vmatprep.subr.bf16.mxu1 %v898_v0 }
 0x162   :  { %682 = vmatpush3.bf16.msra.mxu1 %v681_v33 }
 0x230   :  { %v298_v27 = vpop.f32.mrb[0].mxu1 }
 0x231   :  { %v299_v28 = vadd.f32 %v579_v26, %v298_v27  ;;  %v627_v29 = vpop.f32.mrb[1].mxu1 }
 0x233   :  { %v302_v30 = vmax.f32 %v299_v28, 0.0 }
 0x235   :  { %637 = vmatmul.mubr.msk.f32.vlgmr.msra.gmra.mrb[2].mxu0 %vm228_vm5, %v302_v30 }
 0x236   :  { %658 = vmatprep.mubr.msk.f32.mxu0 %vm899_vm0, %v900_v1  ;;  %685 = vmatpush3.bf16.msra.mxu0 %v684_v36 }
 0x237   :  { %686 = vmatprep.subr.bf16.mxu0 %v898_v0 }
 0x23a   :  { %688 = vmatpush3.bf16.msra.mxu0 %v687_v44 }
 0x308   :  { %v383_v38 = vpop.f32.mrb[2].mxu0 }
 0x309   :  { %v384_v39 = vadd.f32 %v581_v37, %v383_v38  ;;  %v638_v40 = vpop.f32.mrb[3].mxu0 }
 0x30b   :  { %v387_v41 = vmax.f32 %v384_v39, 0.0 }
 0x30d   :  { %648 = vmatmul.mubr.msk.f32.vlgmr.msra.gmra.mrb[2].mxu1 %vm228_vm5, %v387_v41 }
 0x3e0   :  { %v468_v46 = vpop.f32.mrb[2].mxu1 }
 0x3e1   :  { %v469_v47 = vadd.f32 %v583_v45, %v468_v46  ;;  %v649_v48 = vpop.f32.mrb[3].mxu1 }
 0x3e3   :  { %v472_v49 = vmax.f32 %v469_v47, 0.0 }
 0x3e5   :  { %659 = vmatmul.mubr.msk.f32.vlgmr.msra.gmra.mrb[4].mxu0 %vm228_vm5, %v472_v49 }
 0x4b8   :  { %v553_v51 = vpop.f32.mrb[4].mxu0 }
 0x4b9   :  { %v554_v52 = vadd.f32 %v585_v50, %v553_v51  ;;  %v660_v53 = vpop.f32.mrb[5].mxu0 }
 0x4bb   :  { %557 = vst [vmem:[#allocation14] sm:$0xff] %v554_v52 }
 0x4bc   :  { %868 = shalt.err (!%p865_p4)
}
 0x4bd   :  { %s869_s16 = scalar_lea.hbm %s1121_s11, 128 }
 0x4be   :  { %p870_p5 = scmp.ne.s32.totalorder %s1121_s11, %s869_s16  ;;  %p873_p6 = scmp.lt.u32.totalorder %s869_s16, %s1121_s11 }
 0x4c0   :  { %p875_p7 = pnand %p873_p6, %p870_p5 }
 0x4c2   :  { %878 = shalt.err (!%p875_p7)
}
 0x4c3   :  { %567 = dma.vmem_to_hbm [thread:$0]  %s565_s28, 128, %s1121_s11, [#allocation4]  }
 0x4c4   :  { %887 = dma.done.wait [#allocation4], 128  }
 0x4c5   :  { %888 = vsyncadd [#allocation4], 4294967168 }
 0x4c6   :  { %571 = vsyncpa [#allocation3], 1 }
 0x4c7   :  { %572 = vsyncpa [#allocation6], 1 }
 0x4c8   :  { %573 = vsyncpa [#allocation9], 1 }
 0x4c9   :  { %574 = vsyncpa [#allocation12], 1 }
 0x4ca   :  { %575 = vsyncpa [#allocation4], 1 }

</bundles_post_ra>
